<compile_context>
chip_gen: v7x
topology: tpu7x:2x2x1
jax: 0.10.0
libtpu: 0.0.40
codegen_flags: <defaults>
</compile_context>

<pallas_src>
import math

import jax
import jax.numpy as jnp
from jax.experimental import pallas as pl
from jax.experimental.pallas import tpu as pltpu

EPS = 1e-12


def _erf_f32(x):
    # TODO(synk): exact lax.erf has no guaranteed Mosaic lowering; use the
    # Abramowitz & Stegun 7.1.26 polynomial (|abs err| < 2e-7), built only from
    # mul/add/div/exp/where which always lower on TPU.
    a1 = 0.254829592
    a2 = -0.284496736
    a3 = 1.421413741
    a4 = -1.453152027
    a5 = 1.061405429
    p = 0.3275911
    ax = jnp.abs(x)
    t = 1.0 / (1.0 + p * ax)
    poly = ((((a5 * t + a4) * t + a3) * t + a2) * t + a1) * t
    y = 1.0 - poly * jnp.exp(-(ax * ax))
    return jnp.where(x >= 0.0, y, -y)


def _gelu_exact(x):
    # x * 0.5 * (1 + erf(x / sqrt(2)))  -- matches the PyTorch reference gelu.
    return x * 0.5 * (1.0 + _erf_f32(x * (1.0 / math.sqrt(2.0))))


def bert_head_transform_kernel(x_ref, w_ref, b_ref, g_ref, beta_ref, o_ref):
    # dense: x @ W + b  (MXU, f32 accumulation regardless of input dtype)
    h = jnp.dot(x_ref[...], w_ref[...], preferred_element_type=jnp.float32)
    h = h + b_ref[...].astype(jnp.float32)
    # activation: config.hidden_act == "gelu" (exact erf form)
    h = _gelu_exact(h)
    # BertLayerNorm (TF style, eps inside the sqrt), all math in f32.
    u = jnp.mean(h, axis=-1, keepdims=True)
    d = h - u
    s = jnp.mean(d * d, axis=-1, keepdims=True)
    xn = d * jax.lax.rsqrt(s + EPS)  # rsqrt -> EUP slot; cheaper than a VALU divide
    o_ref[...] = (g_ref[...].astype(jnp.float32) * xn
                  + beta_ref[...].astype(jnp.float32)).astype(o_ref.dtype)


def bert_prediction_head_transform(hidden_states, w, b, gamma, beta, *,
                                   row_tile=256, matmul_dtype=None,
                                   out_dtype=None):
    """hidden_states: [..., H].  w: [H, H] already in x@W layout (torch weight
    transposed).  b / gamma / beta: [H].

    row_tile: rows per grid step (rounded to a multiple of 8; default 256 keeps
      the MXU busy and amortizes per-step pipeline overhead on v5e/v6e/v7x).
    matmul_dtype: optionally cast x and W (e.g. jnp.bfloat16) for the MXU while
      keeping f32 accumulation and f32 LayerNorm math.
    """
    orig_shape = hidden_states.shape
    H = orig_shape[-1]
    rows = int(math.prod(orig_shape[:-1]))
    out_dtype = out_dtype if out_dtype is not None else hidden_states.dtype

    x2 = hidden_states.reshape(rows, H)
    if matmul_dtype is not None:
        x2 = x2.astype(matmul_dtype)
        w = w.astype(matmul_dtype)
    b2 = b.reshape(1, H).astype(jnp.float32)
    g2 = gamma.reshape(1, H).astype(jnp.float32)
    beta2 = beta.reshape(1, H).astype(jnp.float32)

    # Keep the tile sublane-aligned; shrink it for tiny inputs, then zero-pad
    # rows to a whole number of tiles (padded rows are sliced off afterwards).
    row_tile = max(8, (int(row_tile) // 8) * 8)
    row_tile = min(row_tile, pl.cdiv(rows, 8) * 8)
    padded_rows = pl.cdiv(rows, row_tile) * row_tile
    if padded_rows != rows:
        x2 = jnp.pad(x2, ((0, padded_rows - rows), (0, 0)))

    out = pl.pallas_call(
        bert_head_transform_kernel,
        out_shape=jax.ShapeDtypeStruct((padded_rows, H), out_dtype),
        grid_spec=pltpu.PrefetchScalarGridSpec(
            num_scalar_prefetch=0,
            grid=(padded_rows // row_tile,),
            in_specs=[
                pl.BlockSpec((row_tile, H), lambda i: (i, 0)),   # activation tile
                # Constant index_map: the (H, H) weight and the bias/LN vectors
                # are DMA'd once and stay resident across the whole row grid.
                pl.BlockSpec((H, H), lambda i: (0, 0)),          # weight (resident)
                pl.BlockSpec((1, H), lambda i: (0, 0)),          # bias
                pl.BlockSpec((1, H), lambda i: (0, 0)),          # LN gamma
                pl.BlockSpec((1, H), lambda i: (0, 0)),          # LN beta
            ],
            out_specs=pl.BlockSpec((row_tile, H), lambda i: (i, 0)),
        ),
        compiler_params=pltpu.CompilerParams(
            # Single independent row axis: shards across the 2 TCs on v7x,
            # no-op (but harmless) on v5e/v6e.
            dimension_semantics=("parallel",),
            vmem_limit_bytes=64 * 1024 * 1024,
        ),
    )(x2, w, b2, g2, beta2)

    if padded_rows != rows:
        out = out[:rows]
    return out.reshape(orig_shape)


def reference(hidden_states, w, b, gamma, beta):
    h = hidden_states @ w + b
    h = h * 0.5 * (1.0 + jax.lax.erf(h / math.sqrt(2.0)))
    u = jnp.mean(h, axis=-1, keepdims=True)
    s = jnp.mean((h - u) ** 2, axis=-1, keepdims=True)
    xn = (h - u) / jnp.sqrt(s + EPS)
    return gamma * xn + beta


if __name__ == "__main__":
    B, S, H = 2, 8, 32  # batch, seq, hidden_size (toy demo shape)

    key = jax.random.PRNGKey(0)
    k1, k2, k3, k4, k5 = jax.random.split(key, 5)

    hidden_states = jax.random.normal(k1, (B, S, H), dtype=jnp.float32)

    # nn.Linear(H, H): torch weight is [out, in]; we store W.T so kernel does x @ W.
    w_torch = jax.random.normal(k2, (H, H), dtype=jnp.float32) * (1.0 / math.sqrt(H))
    w = w_torch.T
    b = jax.random.normal(k3, (H,), dtype=jnp.float32) * 0.02
    gamma = 1.0 + 0.1 * jax.random.normal(k4, (H,), dtype=jnp.float32)
    beta = 0.02 * jax.random.normal(k5, (H,), dtype=jnp.float32)

    # f32 path (tight correctness check against exact-erf reference).
    out = bert_prediction_head_transform(hidden_states, w, b, gamma, beta)
    out = jax.block_until_ready(out)
    ref = reference(hidden_states, w, b, gamma, beta)
    assert jnp.allclose(out, ref, atol=1e-4, rtol=1e-4), (
        "f32 mismatch, max abs err = %s" % jnp.max(jnp.abs(out - ref)))

    # bf16-MXU path (production config on v6e/v7x): bf16 x/W, f32 acc + f32 LN.
    out_bf16 = bert_prediction_head_transform(
        hidden_states, w, b, gamma, beta, matmul_dtype=jnp.bfloat16)
    out_bf16 = jax.block_until_ready(out_bf16)
    assert float(jnp.max(jnp.abs(out_bf16 - ref))) < 0.35, "bf16 path sanity check failed"

    print("KERNEL_OK")
</pallas_src>

<mosaic_0001>
module attributes {stable_mosaic.version = 11 : i64} {
  func.func @bert_head_transform_kernel(%arg0: i32, %arg1: memref<16x32xf32, #tpu.memory_space<vmem>>, %arg2: memref<32x32xf32, #tpu.memory_space<vmem>>, %arg3: memref<1x32xf32, #tpu.memory_space<vmem>>, %arg4: memref<1x32xf32, #tpu.memory_space<vmem>>, %arg5: memref<1x32xf32, #tpu.memory_space<vmem>>, %arg6: memref<16x32xf32, #tpu.memory_space<vmem>>) attributes {dimension_semantics = [#tpu.dimension_semantics<parallel>], iteration_bounds = array<i64: 1>, scalar_prefetch = 0 : i64, scratch_operands = 0 : i64, tpu.core_type = #tpu.core_type<tc>, window_params = [{transform_indices = @transform_0, window_bounds = array<i64: 16, 32>}, {pipeline_mode = #tpu.pipeline_mode<synchronous>, transform_indices = @transform_1, window_bounds = array<i64: 32, 32>}, {pipeline_mode = #tpu.pipeline_mode<synchronous>, transform_indices = @transform_2, window_bounds = array<i64: 1, 32>}, {pipeline_mode = #tpu.pipeline_mode<synchronous>, transform_indices = @transform_3, window_bounds = array<i64: 1, 32>}, {pipeline_mode = #tpu.pipeline_mode<synchronous>, transform_indices = @transform_4, window_bounds = array<i64: 1, 32>}, {transform_indices = @transform_5, window_bounds = array<i64: 16, 32>}]} {
    %c0 = arith.constant 0 : index
    %c0_0 = arith.constant 0 : index
    %0 = vector.load %arg1[%c0, %c0_0] : memref<16x32xf32, #tpu.memory_space<vmem>>, vector<16x32xf32>
    %c0_1 = arith.constant 0 : index
    %c0_2 = arith.constant 0 : index
    %1 = vector.load %arg2[%c0_1, %c0_2] : memref<32x32xf32, #tpu.memory_space<vmem>>, vector<32x32xf32>
    %cst = arith.constant dense<0.000000e+00> : vector<16x32xf32>
    %2 = tpu.matmul %0, %1, %cst {dimension_numbers = #tpu.dot_dimension_numbers<[1], [0], [0], [1], [0, 0, 1, 1], [], []>} : vector<16x32xf32>, vector<32x32xf32>, vector<16x32xf32> -> vector<16x32xf32>
    %c0_3 = arith.constant 0 : index
    %c0_4 = arith.constant 0 : index
    %3 = vector.load %arg3[%c0_3, %c0_4] : memref<1x32xf32, #tpu.memory_space<vmem>>, vector<1x32xf32>
    %4 = vector.broadcast %3 : vector<1x32xf32> to vector<16x32xf32>
    %5 = arith.addf %2, %4 : vector<16x32xf32>
    %cst_5 = arith.constant 5.000000e-01 : f32
    %6 = vector.broadcast %cst_5 : f32 to vector<16x32xf32>
    %7 = arith.mulf %5, %6 : vector<16x32xf32>
    %cst_6 = arith.constant 0.707106769 : f32
    %8 = vector.broadcast %cst_6 : f32 to vector<16x32xf32>
    %9 = arith.mulf %5, %8 : vector<16x32xf32>
    %10 = math.absf %9 : vector<16x32xf32>
    %cst_7 = arith.constant 0.327591091 : f32
    %11 = vector.broadcast %cst_7 : f32 to vector<16x32xf32>
    %12 = arith.mulf %11, %10 : vector<16x32xf32>
    %cst_8 = arith.constant 1.000000e+00 : f32
    %13 = vector.broadcast %cst_8 : f32 to vector<16x32xf32>
    %14 = arith.addf %13, %12 : vector<16x32xf32>
    %cst_9 = arith.constant 1.000000e+00 : f32
    %15 = vector.broadcast %cst_9 : f32 to vector<16x32xf32>
    %16 = arith.divf %15, %14 : vector<16x32xf32>
    %cst_10 = arith.constant 1.06140542 : f32
    %17 = vector.broadcast %cst_10 : f32 to vector<16x32xf32>
    %18 = arith.mulf %17, %16 : vector<16x32xf32>
    %cst_11 = arith.constant -1.45315206 : f32
    %19 = vector.broadcast %cst_11 : f32 to vector<16x32xf32>
    %20 = arith.addf %18, %19 : vector<16x32xf32>
    %21 = arith.mulf %20, %16 : vector<16x32xf32>
    %cst_12 = arith.constant 1.42141378 : f32
    %22 = vector.broadcast %cst_12 : f32 to vector<16x32xf32>
    %23 = arith.addf %21, %22 : vector<16x32xf32>
    %24 = arith.mulf %23, %16 : vector<16x32xf32>
    %cst_13 = arith.constant -0.284496725 : f32
    %25 = vector.broadcast %cst_13 : f32 to vector<16x32xf32>
    %26 = arith.addf %24, %25 : vector<16x32xf32>
    %27 = arith.mulf %26, %16 : vector<16x32xf32>
    %cst_14 = arith.constant 0.254829586 : f32
    %28 = vector.broadcast %cst_14 : f32 to vector<16x32xf32>
    %29 = arith.addf %27, %28 : vector<16x32xf32>
    %30 = arith.mulf %29, %16 : vector<16x32xf32>
    %31 = arith.mulf %10, %10 : vector<16x32xf32>
    %cst_15 = arith.constant 0.000000e+00 : f32
    %32 = vector.broadcast %cst_15 : f32 to vector<16x32xf32>
    %33 = arith.subf %32, %31 : vector<16x32xf32>
    %34 = math.exp %33 : vector<16x32xf32>
    %35 = arith.mulf %30, %34 : vector<16x32xf32>
    %cst_16 = arith.constant 1.000000e+00 : f32
    %36 = vector.broadcast %cst_16 : f32 to vector<16x32xf32>
    %37 = arith.subf %36, %35 : vector<16x32xf32>
    %cst_17 = arith.constant 0.000000e+00 : f32
    %38 = vector.broadcast %cst_17 : f32 to vector<16x32xf32>
    %39 = arith.cmpf oge, %9, %38 : vector<16x32xf32>
    %cst_18 = arith.constant 0.000000e+00 : f32
    %40 = vector.broadcast %cst_18 : f32 to vector<16x32xf32>
    %41 = arith.subf %40, %37 : vector<16x32xf32>
    %42 = arith.select %39, %37, %41 : vector<16x32xi1>, vector<16x32xf32>
    %cst_19 = arith.constant 1.000000e+00 : f32
    %43 = vector.broadcast %cst_19 : f32 to vector<16x32xf32>
    %44 = arith.addf %43, %42 : vector<16x32xf32>
    %45 = arith.mulf %7, %44 : vector<16x32xf32>
    %cst_20 = arith.constant dense<0.000000e+00> : vector<16xf32>
    %46 = vector.multi_reduction <add>, %45, %cst_20 [1] : vector<16x32xf32> to vector<16xf32>
    %47 = vector.shape_cast %46 : vector<16xf32> to vector<16x1xf32>
    %cst_21 = arith.constant 3.200000e+01 : f32
    %48 = vector.broadcast %cst_21 : f32 to vector<16x1xf32>
    %49 = arith.divf %47, %48 : vector<16x1xf32>
    %50 = vector.broadcast %49 : vector<16x1xf32> to vector<16x32xf32>
    %51 = arith.subf %45, %50 : vector<16x32xf32>
    %52 = arith.mulf %51, %51 : vector<16x32xf32>
    %cst_22 = arith.constant dense<0.000000e+00> : vector<16xf32>
    %53 = vector.multi_reduction <add>, %52, %cst_22 [1] : vector<16x32xf32> to vector<16xf32>
    %54 = vector.shape_cast %53 : vector<16xf32> to vector<16x1xf32>
    %cst_23 = arith.constant 3.200000e+01 : f32
    %55 = vector.broadcast %cst_23 : f32 to vector<16x1xf32>
    %56 = arith.divf %54, %55 : vector<16x1xf32>
    %cst_24 = arith.constant 9.99999996E-13 : f32
    %57 = vector.broadcast %cst_24 : f32 to vector<16x1xf32>
    %58 = arith.addf %56, %57 : vector<16x1xf32>
    %59 = math.rsqrt %58 : vector<16x1xf32>
    %60 = vector.broadcast %59 : vector<16x1xf32> to vector<16x32xf32>
    %61 = arith.mulf %51, %60 : vector<16x32xf32>
    %c0_25 = arith.constant 0 : index
    %c0_26 = arith.constant 0 : index
    %62 = vector.load %arg4[%c0_25, %c0_26] : memref<1x32xf32, #tpu.memory_space<vmem>>, vector<1x32xf32>
    %63 = vector.broadcast %62 : vector<1x32xf32> to vector<16x32xf32>
    %64 = arith.mulf %63, %61 : vector<16x32xf32>
    %c0_27 = arith.constant 0 : index
    %c0_28 = arith.constant 0 : index
    %65 = vector.load %arg5[%c0_27, %c0_28] : memref<1x32xf32, #tpu.memory_space<vmem>>, vector<1x32xf32>
    %66 = vector.broadcast %65 : vector<1x32xf32> to vector<16x32xf32>
    %67 = arith.addf %64, %66 : vector<16x32xf32>
    %c0_29 = arith.constant 0 : index
    %c0_30 = arith.constant 0 : index
    %68 = vector.load %arg6[%c0_29, %c0_30] : memref<16x32xf32, #tpu.memory_space<vmem>>, vector<16x32xf32>
    tpu.vector_store %arg6[%c0_29, %c0_30], %67 {strides = array<i32>} : memref<16x32xf32, #tpu.memory_space<vmem>>, vector<16x32xf32>,
    return
  }
  func.func @transform_0(%arg0: i32) -> (i32, i32) {
    %c0_i32 = arith.constant 0 : i32
    %c0_i32_0 = arith.constant 0 : i32
    return %arg0, %c0_i32 : i32, i32
  }
  func.func @transform_1(%arg0: i32) -> (i32, i32) {
    %c0_i32 = arith.constant 0 : i32
    %c0_i32_0 = arith.constant 0 : i32
    %c0_i32_1 = arith.constant 0 : i32
    return %c0_i32, %c0_i32_0 : i32, i32
  }
  func.func @transform_2(%arg0: i32) -> (i32, i32) {
    %c0_i32 = arith.constant 0 : i32
    %c0_i32_0 = arith.constant 0 : i32
    %c0_i32_1 = arith.constant 0 : i32
    return %c0_i32, %c0_i32_0 : i32, i32
  }
  func.func @transform_3(%arg0: i32) -> (i32, i32) {
    %c0_i32 = arith.constant 0 : i32
    %c0_i32_0 = arith.constant 0 : i32
    %c0_i32_1 = arith.constant 0 : i32
    return %c0_i32, %c0_i32_0 : i32, i32
  }
  func.func @transform_4(%arg0: i32) -> (i32, i32) {
    %c0_i32 = arith.constant 0 : i32
    %c0_i32_0 = arith.constant 0 : i32
    %c0_i32_1 = arith.constant 0 : i32
    return %c0_i32, %c0_i32_0 : i32, i32
  }
  func.func @transform_5(%arg0: i32) -> (i32, i32) {
    %c0_i32 = arith.constant 0 : i32
    %c0_i32_0 = arith.constant 0 : i32
    return %arg0, %c0_i32 : i32, i32
  }
}

</mosaic_0001>

<bundles_post_ra>
// kernel: tpu_custom_call.1
= control target key start
LH: loop header
LB: loop body
LE: loop exit
PB: predicated region body
PF: predicated region fallthrough
CT: control target
= control target key end

     0   :  { %10 = vsyncpa [#allocation3], 0  ;;  %s623_s0 = inlined_call_operand.hbm [shape: f32[16,32], index: 0, kind: input, shape index: {}]   ;;  %s624_s1 = inlined_call_operand.hbm [shape: f32[32,32], index: 1, kind: input, shape index: {}]   ;;  %s625_s2 = inlined_call_operand.hbm [shape: f32[1,32], index: 2, kind: input, shape index: {}]   ;;  %s626_s3 = inlined_call_operand.hbm [shape: f32[1,32], index: 3, kind: input, shape index: {}]   ;;  %s627_s4 = inlined_call_operand.hbm [shape: f32[1,32], index: 4, kind: input, shape index: {}]   ;;  %s628_s5 = inlined_call_operand.hbm [shape: f32[16,32], index: 5, kind: output, shape index: {}]  }
   0x1   :  { %11 = vsyncpa [#allocation6], 0 }
   0x2   :  { %12 = vsyncpa [#allocation9], 0 }
   0x3   :  { %13 = vsyncpa [#allocation4], 0  ;;  %s488_s18 = smov [#allocation5]   ;;  %s489_s20 = smov [#allocation8]  }
   0x4   :  { %s31_s19 = sshll.u32 %s488_s18, 4  ;;  %s54_s21 = sshll.u32 %s489_s20, 4  ;;  %s32_s19 = int_to_ptr.vmem [resolvable:$true] %s31_s19  ;;  %s526_s21 = int_to_ptr.vmem [resolvable:$true] %s54_s21 }
   0x5   :  { %s348_s24 = scalar_lea.hbm %s624_s1, 512 }
   0x6   :  { %p349_p0 = scmp.ne.s32.totalorder %s624_s1, %s348_s24  ;;  %p352_p1 = scmp.lt.u32.totalorder %s348_s24, %s624_s1 }
   0x8   :  { %p354_p2 = pnand %p352_p1, %p349_p0 }
   0xa   :  { %357 = shalt.err (!%p354_p2)
}
   0xb   :  { %s358_s29 = scalar_lea.vmem %s32_s19, 512  ;;  %p363_p4 = scmp.lt.s32.totalorder %s32_s19, %s32_s19 }
   0xc   :  { %p359_p3 = scmp.ne.s32.totalorder %s32_s19, %s358_s29  ;;  %p364_p5 = scmp.lt.s32.totalorder %s358_s29, %s358_s29 }
   0xe   :  { %p365_p6 = por %p364_p5, %p363_p4 }
  0x10   :  { %p366_p7 = pnand %p365_p6, %p359_p3 }
  0x12   :  { %369 = shalt.err (!%p366_p7)
}
  0x13   :  { %s490_s30 = smov 128   ;;  %s491_s6 = smov 8  }
  0x14   :  { %37 = dma.hbm_to_vmem [thread:$0]  %s624_s1, 512, %s32_s19, [#allocation6], %s490_s30, %s490_s30, %s491_s6  }
  0x15   :  { %s370_s11 = scalar_lea.hbm %s626_s3, 16 }
  0x16   :  { %p371_p8 = scmp.ne.s32.totalorder %s626_s3, %s370_s11  ;;  %p374_p9 = scmp.lt.u32.totalorder %s370_s11, %s626_s3 }
  0x18   :  { %p376_p10 = pnand %p374_p9, %p371_p8 }
  0x1a   :  { %379 = shalt.err (!%p376_p10)
}
  0x1b   :  { %s380_s16 = scalar_lea.vmem %s526_s21, 16  ;;  %s384_s1 = scalar_lea.vmem %s526_s21, 32 }
  0x1c   :  { %p381_p11 = scmp.ne.s32.totalorder %s526_s21, %s380_s16  ;;  %p385_p12 = scmp.lt.s32.totalorder %s526_s21, %s526_s21 }
  0x1d   :  { %p386_p13 = scmp.lt.s32.totalorder %s384_s1, %s380_s16 }
  0x1f   :  { %p387_p0 = por %p386_p13, %p385_p12 }
  0x21   :  { %p388_p1 = pnand %p387_p0, %p381_p11 }
  0x23   :  { %391 = shalt.err (!%p388_p1)
}
  0x24   :  { %57 = dma.hbm_to_vmem [thread:$0]  %s626_s3, 16, %s526_s21, [#allocation9]  }
  0x25   :  { %s492_s19 = smov [#allocation2]   ;;  %s493_s22 = smov [#allocation7]  }
  0x26   :  { %s19_s20 = sshll.u32 %s492_s19, 4  ;;  %s44_s23 = sshll.u32 %s493_s22, 4  ;;  %s20_s20 = int_to_ptr.vmem [resolvable:$true] %s19_s20  ;;  %s45_s23 = int_to_ptr.vmem [resolvable:$true] %s44_s23 }
  0x27   :  { %s392_s26 = scalar_lea.hbm %s623_s0, 256 }
  0x28   :  { %p393_p2 = scmp.ne.s32.totalorder %s623_s0, %s392_s26  ;;  %p396_p3 = scmp.lt.u32.totalorder %s392_s26, %s623_s0 }
  0x2a   :  { %p398_p4 = pnand %p396_p3, %p393_p2 }
  0x2c   :  { %401 = shalt.err (!%p398_p4)
}
  0x2d   :  { %s402_s3 = scalar_lea.vmem %s20_s20, 256  ;;  %p407_p6 = scmp.lt.s32.totalorder %s20_s20, %s20_s20 }
  0x2e   :  { %p403_p5 = scmp.ne.s32.totalorder %s20_s20, %s402_s3  ;;  %p408_p7 = scmp.lt.s32.totalorder %s402_s3, %s402_s3 }
  0x30   :  { %p409_p8 = por %p408_p7, %p407_p6 }
  0x32   :  { %p410_p9 = pnand %p409_p8, %p403_p5 }
  0x34   :  { %413 = shalt.err (!%p410_p9)
}
  0x35   :  { %25 = dma.hbm_to_vmem [thread:$0]  %s623_s0, 256, %s20_s20, [#allocation3], %s490_s30, %s490_s30, %s491_s6  }
  0x36   :  { %s414_s11 = scalar_lea.hbm %s625_s2, 16 }
  0x37   :  { %p415_p10 = scmp.ne.s32.totalorder %s625_s2, %s414_s11  ;;  %p418_p11 = scmp.lt.u32.totalorder %s414_s11, %s625_s2 }
  0x39   :  { %p420_p12 = pnand %p418_p11, %p415_p10 }
  0x3b   :  { %423 = shalt.err (!%p420_p12)
}
  0x3c   :  { %s424_s16 = scalar_lea.vmem %s45_s23, 16  ;;  %s428_s1 = scalar_lea.vmem %s45_s23, 32 }
  0x3d   :  { %p425_p13 = scmp.ne.s32.totalorder %s45_s23, %s424_s16  ;;  %p429_p0 = scmp.lt.s32.totalorder %s45_s23, %s45_s23 }
  0x3e   :  { %p430_p1 = scmp.lt.s32.totalorder %s428_s1, %s424_s16 }
  0x40   :  { %p431_p2 = por %p430_p1, %p429_p0 }
  0x42   :  { %p432_p3 = pnand %p431_p2, %p425_p13 }
  0x44   :  { %435 = shalt.err (!%p432_p3)
}
  0x45   :  { %47 = dma.hbm_to_vmem [thread:$0]  %s625_s2, 16, %s45_s23, [#allocation6]  }
  0x46   :  { %s494_s18 = smov [#allocation10]   ;;  %s436_s24 = scalar_lea.hbm %s627_s4, 16 }
  0x47   :  { %s64_s19 = sshll.u32 %s494_s18, 4  ;;  %p437_p4 = scmp.ne.s32.totalorder %s627_s4, %s436_s24  ;;  %s65_s19 = int_to_ptr.vmem [resolvable:$true] %s64_s19 }
  0x48   :  { %p440_p5 = scmp.lt.u32.totalorder %s436_s24, %s627_s4 }
  0x4a   :  { %p442_p6 = pnand %p440_p5, %p437_p4 }
  0x4c   :  { %445 = shalt.err (!%p442_p6)
}
  0x4d   :  { %s446_s29 = scalar_lea.vmem %s65_s19, 16  ;;  %s450_s2 = scalar_lea.vmem %s65_s19, 32 }
  0x4e   :  { %p447_p7 = scmp.ne.s32.totalorder %s65_s19, %s446_s29  ;;  %p451_p8 = scmp.lt.s32.totalorder %s65_s19, %s65_s19 }
  0x4f   :  { %p452_p9 = scmp.lt.s32.totalorder %s450_s2, %s446_s29 }
  0x51   :  { %p453_p10 = por %p452_p9, %p451_p8 }
  0x53   :  { %p454_p11 = pnand %p453_p10, %p447_p7 }
  0x55   :  { %457 = shalt.err (!%p454_p11)
}
  0x56   :  { %67 = dma.hbm_to_vmem [thread:$0]  %s627_s4, 16, %s65_s19, [#allocation9]  }
  0x57   :  { %480 = dma.done.wait [#allocation3], 256  }
  0x58   :  { %481 = vsyncadd [#allocation3], 4294967040 }
  0x59   :  { %482 = dma.done.wait [#allocation6], 528  }
  0x5a   :  { %483 = vsyncadd [#allocation6], 4294966768 }
  0x5b   :  { %484 = dma.done.wait [#allocation9], 32  }
  0x5c   :  { %485 = vsyncadd [#allocation9], 4294967264  ;;  %vm96_vm0 = vcmask 261120   ;;  %v85_v0 = vld [vmem:[#allocation5] sm:$0xff]  ;;  %v86_v1 = vld [vmem:[#allocation5 + $0x8] sm:$0xff]  ;;  %s495_s4 = smov [#allocation11]  }
  0x5d   :  { %v87_v2 = vld [vmem:[#allocation5 + $0x10] sm:$0xff]  ;;  %v320_v3 = vpack.c.bf16 %v86_v1, %v85_v0  ;;  %v88_v4 = vld [vmem:[#allocation5 + $0x18] sm:$0xff]  ;;  %v298_v8 = vld [vmem:[#allocation7] ss:$0 sm:$0xff]  ;;  %s284_s3 = sshll.u32 %s495_s4, 4  ;;  %s285_s3 = int_to_ptr.vmem [resolvable:$true] %s284_s3 }
  0x5e   :  { %v83_v5 = vld [vmem:[#allocation2] sm:$0xff]  ;;  %v324_v6 = vpack.c.bf16 %v88_v4, %v87_v2  ;;  %v84_v7 = vld [vmem:[#allocation2 + $0x8] sm:$0xff]  ;;  %s458_s21 = scalar_lea.vmem %s285_s3, 256  ;;  %p463_p13 = scmp.lt.s32.totalorder %s285_s3, %s285_s3 }
  0x5f   :  { %317 = vmatprep.mubr.msk.f32.mxu0 %vm96_vm0, %v83_v5  ;;  %321 = vmatprep.subr.bf16.mxu0 %v320_v3  ;;  %p459_p12 = scmp.ne.s32.totalorder %s285_s3, %s458_s21  ;;  %p464_p0 = scmp.lt.s32.totalorder %s458_s21, %s458_s21 }
  0x60   :  { %323 = vmatpush3.bf16.msra.mxu0 %v320_v3 }
  0x61   :  { %325 = vmatprep.subr.bf16.mxu0 %v324_v6  ;;  %p465_p1 = por %p464_p0, %p463_p13 }
  0x63   :  { %p466_p2 = pnand %p465_p1, %p459_p12 }
  0x64   :  { %327 = vmatpush3.bf16.msra.mxu0 %v324_v6 }
  0x67   :  { %318 = vmatmul.mubr.msk.f32.vlgmr.msra.gmra.mrb[0].mxu0 %vm96_vm0, %v84_v7 }
 0x13a   :  { %v319_v9 = vpop.f32.mrb[0].mxu0 }
 0x13b   :  { %v175_v10 = vadd.f32 %v319_v9, %v298_v8  ;;  %v169_v11 = vpop.f32.mrb[1].mxu0 }
 0x13c   :  { %v170_v12 = vadd.f32 %v298_v8, %v169_v11 }
 0x13d   :  { %v181_v13 = vmul.f32 0.70710677, %v175_v10  ;;  %v179_v60 = vmul.f32 0.5, %v175_v10 }
 0x13e   :  { %v180_v14 = vmul.f32 0.70710677, %v170_v12  ;;  %v178_v57 = vmul.f32 0.5, %v170_v12 }
 0x13f   :  { %v183_v15 = vand.u32 2147483647, %v181_v13  ;;  %vm223_vm1 = vcmp.ge.f32.partialorder %v181_v13, 0.0 }
 0x140   :  { %v182_v16 = vand.u32 2147483647, %v180_v14  ;;  %vm222_vm2 = vcmp.ge.f32.partialorder %v180_v14, 0.0 }
 0x141   :  { %v185_v17 = vmul.f32 0.3275911, %v183_v15  ;;  %v211_v21 = vmul.f32 %v183_v15, %v183_v15 }
 0x142   :  { %v184_v18 = vmul.f32 0.3275911, %v182_v16  ;;  %v210_v22 = vmul.f32 %v182_v16, %v182_v16 }
 0x143   :  { %v187_v19 = vadd.f32 1.0, %v185_v17  ;;  %v213_v24 = vsub.f32 0.0, %v211_v21 }
 0x144   :  { %v186_v20 = vadd.f32 1.0, %v184_v18  ;;  %v212_v26 = vsub.f32 0.0, %v210_v22  ;;  %v301_v18 = vld [vmem:[#allocation8] ss:$0 sm:$0xff] }
 0x145   :  { %336 = vrcp.f32 %v187_v19  ;;  %v216_v30 = vmul.f32 1.442695, %v213_v24 }
 0x146   :  { %338 = vrcp.f32 %v186_v20  ;;  %v214_v32 = vmul.f32 1.442695, %v212_v26  ;;  %v302_v20 = vld [vmem:[#allocation10] ss:$0 sm:$0xff] }
 0x147   :  { %340 = vpow2.f32 %v216_v30 }
 0x148   :  { %342 = vpow2.f32 %v214_v32 }
 0x14f   :  { %v337_v23 = vpop.eup %336 }
 0x150   :  { %v339_v25 = vpop.eup %338  ;;  %v193_v27 = vmul.f32 1.0614054, %v337_v23 }
 0x151   :  { %v192_v28 = vmul.f32 1.0614054, %v339_v25  ;;  %v341_v46 = vpop.eup %340 }
 0x152   :  { %v195_v29 = vadd.f32 -1.4531521, %v193_v27  ;;  %v343_v48 = vpop.eup %342 }
 0x153   :  { %v194_v31 = vadd.f32 -1.4531521, %v192_v28 }
 0x154   :  { %v197_v33 = vmul.f32 %v337_v23, %v195_v29 }
 0x155   :  { %v196_v34 = vmul.f32 %v339_v25, %v194_v31 }
 0x156   :  { %v199_v35 = vadd.f32 1.4214138, %v197_v33 }
 0x157   :  { %v198_v36 = vadd.f32 1.4214138, %v196_v34 }
 0x158   :  { %v201_v37 = vmul.f32 %v337_v23, %v199_v35 }
 0x159   :  { %v200_v38 = vmul.f32 %v339_v25, %v198_v36 }
 0x15a   :  { %v203_v39 = vadd.f32 -0.28449672, %v201_v37 }
 0x15b   :  { %v202_v40 = vadd.f32 -0.28449672, %v200_v38 }
 0x15c   :  { %v205_v41 = vmul.f32 %v337_v23, %v203_v39 }
 0x15d   :  { %v204_v42 = vmul.f32 %v339_v25, %v202_v40 }
 0x15e   :  { %v207_v43 = vadd.f32 0.2548296, %v205_v41 }
 0x15f   :  { %v206_v44 = vadd.f32 0.2548296, %v204_v42 }
 0x160   :  { %v209_v45 = vmul.f32 %v337_v23, %v207_v43 }
 0x161   :  { %v208_v47 = vmul.f32 %v339_v25, %v206_v44 }
 0x162   :  { %v219_v49 = vmul.f32 %v341_v46, %v209_v45 }
 0x163   :  { %v218_v50 = vmul.f32 %v343_v48, %v208_v47 }
 0x164   :  { %v221_v51 = vsub.f32 1.0, %v219_v49 }
 0x165   :  { %v220_v52 = vsub.f32 1.0, %v218_v50 }
 0x166   :  { %v225_v53 = vsub.f32 0.0, %v221_v51 }
 0x167   :  { %v224_v54 = vsub.f32 0.0, %v220_v52 }
 0x168   :  { %v227_v55 = vsel %vm223_vm1, %v221_v51, %v225_v53 }
 0x169   :  { %v226_v56 = vsel %vm222_vm2, %v220_v52, %v224_v54  ;;  %v229_v59 = vadd.f32 1.0, %v227_v55 }
 0x16a   :  { %v228_v58 = vadd.f32 1.0, %v226_v56 }
 0x16b   :  { %v231_v63 = vmul.f32 %v229_v59, %v179_v60 }
 0x16c   :  { %v230_v61 = vmul.f32 %v228_v58, %v178_v57 }
 0x16d   :  { %v235_v0 = vsel %vm96_vm0, %v231_v63, 0.0 }
 0x16e   :  { %v232_v62 = vsel %vm96_vm0, %v230_v61, 0.0 }
 0x16f   :  { %233 = vadd.xlane.f32.xlu0 %v232_v62 }
 0x173   :  { %236 = vadd.xlane.f32.xlu0 %v235_v0 }
 0x1fc   :  { %v234_v1 = vpop.xlane.xlu0 %233 }
 0x1fd   :  { %v239_v2 = vmul.f32 0.03125, %v234_v1 }
 0x1ff   :  { %v241_v3 = vsub.f32 %v230_v61, %v239_v2 }
 0x200   :  { %v237_v4 = vpop.xlane.xlu0 %236 }
 0x201   :  { %v240_v5 = vmul.f32 0.03125, %v237_v4  ;;  %v243_v6 = vmul.f32 %v241_v3, %v241_v3 }
 0x203   :  { %v242_v7 = vsub.f32 %v231_v63, %v240_v5  ;;  %v245_v8 = vsel %vm96_vm0, %v243_v6, 0.0 }
 0x204   :  { %246 = vadd.xlane.f32.xlu1 %v245_v8 }
 0x205   :  { %v244_v9 = vmul.f32 %v242_v7, %v242_v7 }
 0x207   :  { %v248_v10 = vsel %vm96_vm0, %v244_v9, 0.0 }
 0x208   :  { %249 = vadd.xlane.f32.xlu1 %v248_v10 }
 0x291   :  { %v247_v11 = vpop.xlane.xlu1 %246 }
 0x292   :  { %v251_v12 = vmul.f32 0.03125, %v247_v11 }
 0x294   :  { %v253_v13 = vadd.f32 1e-12, %v251_v12 }
 0x295   :  { %v250_v14 = vpop.xlane.xlu1 %249 }
 0x296   :  { %344 = vrsqrt.f32 %v253_v13  ;;  %v252_v15 = vmul.f32 0.03125, %v250_v14 }
 0x298   :  { %v254_v16 = vadd.f32 1e-12, %v252_v15 }
 0x29a   :  { %346 = vrsqrt.f32 %v254_v16 }
 0x2a0   :  { %v345_v17 = vpop.eup %344 }
 0x2a1   :  { %v257_v19 = vmul.f32 %v345_v17, %v241_v3 }
 0x2a3   :  { %v266_v21 = vmul.f32 %v301_v18, %v257_v19 }
 0x2a4   :  { %v347_v22 = vpop.eup %346 }
 0x2a5   :  { %v258_v23 = vmul.f32 %v347_v22, %v242_v7  ;;  %v275_v24 = vadd.f32 %v302_v20, %v266_v21 }
 0x2a7   :  { %v267_v25 = vmul.f32 %v301_v18, %v258_v23  ;;  %277 = vst.msk [vmem:[#allocation11] sm:$0xff] %vm96_vm0, %v275_v24 }
 0x2a9   :  { %v276_v26 = vadd.f32 %v302_v20, %v267_v25 }
 0x2ab   :  { %278 = vst.msk [vmem:[#allocation11 + $0x8] sm:$0xff] %vm96_vm0, %v276_v26 }
 0x2ac   :  { %469 = shalt.err (!%p466_p2)
}
 0x2ad   :  { %s470_s10 = scalar_lea.hbm %s628_s5, 256 }
 0x2ae   :  { %p471_p3 = scmp.ne.s32.totalorder %s628_s5, %s470_s10  ;;  %p474_p4 = scmp.lt.u32.totalorder %s470_s10, %s628_s5 }
 0x2b0   :  { %p476_p5 = pnand %p474_p4, %p471_p3 }
 0x2b2   :  { %479 = shalt.err (!%p476_p5)
}
 0x2b3   :  { %290 = dma.vmem_to_hbm [thread:$0]  %s285_s3, 256, %s628_s5, [#allocation4], %s490_s30, %s490_s30, %s491_s6  }
 0x2b4   :  { %486 = dma.done.wait [#allocation4], 256  }
 0x2b5   :  { %487 = vsyncadd [#allocation4], 4294967040 }
 0x2b6   :  { %294 = vsyncpa [#allocation3], 1 }
 0x2b7   :  { %295 = vsyncpa [#allocation6], 1 }
 0x2b8   :  { %296 = vsyncpa [#allocation9], 1 }
 0x2b9   :  { %297 = vsyncpa [#allocation4], 1 }

</bundles_post_ra>
